<compile_context>
chip_gen: v5e
topology: v5e:2x2
jax: 0.10.0
libtpu: 0.0.40
codegen_flags: <defaults>
</compile_context>

<pallas_src>
import functools

import jax
import jax.numpy as jnp
from jax import lax
from jax.experimental import pallas as pl
from jax.experimental.pallas import tpu as pltpu

_VMEM_LIMIT_BYTES = 48 * 1024 * 1024   # explicit scoped-VMEM limit (safe on v5e/v6e/v7x)
_TILE_VMEM_BUDGET = 20 * 1024 * 1024   # budget for input double-buffers + live intermediates
_MAX_T_TILE = 8192


def _choose_t_tile(B: int, T: int, L: int, itemsize: int) -> int:
    """Pick the T tile: full T if it fits, else the biggest lane-padding-aware 512-multiple."""
    padded_l = -(-L // 128) * 128
    # Per emission row in VMEM: 2 double-buffered input copies (lane-padded to 128) plus
    # ~4 f32-sized intermediates (iota / eq / cand / transposed cand) the compiler keeps live.
    per_row = 2 * padded_l * itemsize + 4 * padded_l * 4
    cap = max(512, min(_MAX_T_TILE, (_TILE_VMEM_BUDGET // per_row) // 512 * 512))
    if B == 1 and T >= 1024:
        # Expose >= 2 independent T tiles so both v7x TensorCores get work even at batch=1.
        half = -(-T // 2)
        cap = min(cap, max(512, -(-half // 512) * 512))
    return T if T <= cap else cap


def _ctc_greedy_kernel(em_ref, halo_ref, out_ref, *, blank: int):
    """One (batch, T-tile) grid step; fully independent across the grid (halo-based dedup).

    em_ref:   (1, t_tile, L)  emission logits for this tile (native dtype)
    halo_ref: (1, hr, L)      rows whose last row is the previous tile's last timestep
    out_ref:  (1, 1, t_tile)  lane-dense int32 sentinel: argmax label index if the timestep
                              survives unique_consecutive + blank removal, else -1
    """
    t_blk = pl.program_id(1)

    e = em_ref[0]                                        # (t_tile, L), native dtype
    tt, nl = e.shape

    # --- first-occurrence argmax along labels, computed on the raw values (exact) ---------
    lane = lax.broadcasted_iota(jnp.int32, (tt, nl), 1)
    maxv = jnp.max(e, axis=-1, keepdims=True)            # (t_tile, 1)
    cand = jnp.where(e == maxv, lane, nl)                # (t_tile, L), small ints in [0, L]

    # --- relayout per-timestep results onto lanes with an exact MXU identity transpose -----
    # cand_t[l, t] = cand[t, l]; the matmul is exact because cand holds integers <= L.
    eye = (lax.broadcasted_iota(jnp.int32, (nl, nl), 0)
           == lax.broadcasted_iota(jnp.int32, (nl, nl), 1)).astype(jnp.float32)
    cand_t = lax.dot_general(eye, cand.astype(jnp.float32),
                             (((1,), (1,)), ((), ())),
                             preferred_element_type=jnp.float32)      # (L, t_tile)
    idx = jnp.min(cand_t, axis=0, keepdims=True).astype(jnp.int32)    # (1, t_tile), lane-dense
    idx = jnp.minimum(idx, nl - 1)                        # all-NaN row guard

    # --- previous label for this tile's first timestep (from the halo block) ---------------
    hr = halo_ref.shape[1]
    h_all = halo_ref[0]                                   # (hr, L)
    h = h_all[hr - 1:hr, :]                               # (1, L): previous tile's last row
    hlane = lax.broadcasted_iota(jnp.int32, (1, nl), 1)
    hmax = jnp.max(h, axis=-1, keepdims=True)
    hidx = jnp.min(jnp.where(h == hmax, hlane, nl), axis=-1, keepdims=True)
    hidx = jnp.minimum(hidx, nl - 1)                      # (1, 1)
    hprev = jnp.where(t_blk == 0, jnp.int32(-1), hidx)    # no previous timestep at tile 0

    # --- unique_consecutive + blank removal, sentinel-encoded ------------------------------
    prev = pltpu.roll(idx, shift=1, axis=1)               # idx shifted right by one timestep
    col = lax.broadcasted_iota(jnp.int32, (1, tt), 1)
    prev = jnp.where(col == 0, hprev, prev)
    keep = (idx != blank) & (idx != prev)
    out_ref[0] = jnp.where(keep, idx, -1).astype(out_ref.dtype)


def greedy_ctc_sentinel(emission: jax.Array, *, blank: int = 0, t_tile: int | None = None):
    """Runs the kernel.  emission: (B, T, L) or (T, L) float logits.

    Returns int8 (L<=127) / int32 of shape (B, T) (or (T,) if unbatched): the argmax label
    index where the timestep survives CTC collapse (unique_consecutive + blank removal),
    else -1.  If given, t_tile must equal T or be a multiple of 128.
    """
    squeeze = emission.ndim == 2
    if squeeze:
        emission = emission[None]
    B, T, L = emission.shape

    if t_tile is None:
        t_tile = _choose_t_tile(B, T, L, emission.dtype.itemsize)
    t_tile = min(t_tile, T)
    if t_tile != T and t_tile % 128 != 0:
        raise ValueError("t_tile must equal T or be a multiple of 128")
    nt = -(-T // t_tile)                         # ragged last tile: garbage tail sliced off
    halo_rows = 8 if T >= 8 else T               # halo block keeps the (8,128) block rules

    kernel = functools.partial(_ctc_greedy_kernel, blank=blank)
    out = pl.pallas_call(
        kernel,
        out_shape=jax.ShapeDtypeStruct((B, 1, T), jnp.int32),
        grid_spec=pltpu.PrefetchScalarGridSpec(
            num_scalar_prefetch=0,
            grid=(B, nt),
            in_specs=[
                # Main emission tile for this grid step.
                pl.BlockSpec((1, t_tile, L), lambda b, t: (b, t, 0)),
                # Halo: the 8 rows ending at the previous tile's last timestep (ignored at t==0).
                pl.BlockSpec(
                    (1, halo_rows, L),
                    lambda b, t: (b, jnp.maximum(t * (t_tile // halo_rows) - 1, 0), 0),
                ),
            ],
            out_specs=pl.BlockSpec((1, 1, t_tile), lambda b, t: (b, 0, t)),
        ),
        compiler_params=pltpu.CompilerParams(
            dimension_semantics=("parallel", "parallel"),   # grid steps are independent
            vmem_limit_bytes=_VMEM_LIMIT_BYTES,
        ),
    )(emission, emission)

    out = out[:, 0, :T]                                   # (B, T); drop any ragged tail
    if L <= 127:
        out = out.astype(jnp.int8)                        # 4x smaller device->host transfer
    return out[0] if squeeze else out


def greedy_ctc_decode_batch(emissions: jax.Array, labels: str, blank: int = 0):
    """Decode a whole batch (B, T, L) with one kernel call and one host transfer."""
    sent = greedy_ctc_sentinel(emissions, blank=blank)
    sent = jax.device_get(jax.block_until_ready(sent))    # single D2H transfer per batch
    # TODO(synk): the label-string join has no Pallas equivalent; done host-side.
    return ["".join(labels[i] for i in row if i >= 0) for row in sent.tolist()]


def greedy_ctc_decode(emission: jax.Array, labels: str, blank: int = 0) -> str:
    """GreedyCTCDecoder.forward equivalent for a single (T, L) emission."""
    return greedy_ctc_decode_batch(emission[None], labels, blank=blank)[0]


if __name__ == "__main__":
    # labels: 32 symbols, blank ('-') at index 0, matching num_label below.
    labels = "-abcdefghijklmnopqrstuvwxyz .,'?"
    blank = 0
    batch, num_seq, num_label = 2, 128, 32
    assert len(labels) == num_label

    root = jax.random.PRNGKey(0)
    k1, k2 = jax.random.split(root)
    emissions = jax.random.normal(k1, (batch, num_seq, num_label), dtype=jnp.float32)

    # Run the kernel once over the whole batch and block on the result.
    sent = greedy_ctc_sentinel(emissions, blank=blank)
    jax.block_until_ready(sent)

    # Cross-check against a pure-JAX/Python reference of the PyTorch semantics.
    got = greedy_ctc_decode_batch(emissions, labels, blank=blank)
    for b in range(batch):
        ref_idx = jax.device_get(jnp.argmax(emissions[b], axis=-1)).tolist()
        dedup = [ref_idx[0]] + [y for x, y in zip(ref_idx[:-1], ref_idx[1:]) if y != x]
        ref_str = "".join(labels[i] for i in dedup if i != blank)
        assert got[b] == ref_str, (b, got[b], ref_str)

    # Single-utterance path (matches GreedyCTCDecoder.forward signature).
    single = greedy_ctc_decode(emissions[0], labels, blank=blank)
    assert single == got[0], (single, got[0])

    # Multi-tile path: exercises the halo-based dedup across tile boundaries and the
    # fully-parallel (batch, T-tile) grid.
    em2 = jax.random.normal(k2, (batch, 1024, num_label), dtype=jnp.float32)
    sent2 = jax.device_get(jax.block_until_ready(
        greedy_ctc_sentinel(em2, blank=blank, t_tile=256)))
    for b in range(batch):
        ref_idx = jax.device_get(jnp.argmax(em2[b], axis=-1)).tolist()
        dedup = [ref_idx[0]] + [y for x, y in zip(ref_idx[:-1], ref_idx[1:]) if y != x]
        ref_str = "".join(labels[i] for i in dedup if i != blank)
        got_str = "".join(labels[i] for i in sent2[b].tolist() if i >= 0)
        assert got_str == ref_str, (b, got_str[:60], ref_str[:60])

    print("KERNEL_OK")
</pallas_src>

<mosaic_0001>
module attributes {stable_mosaic.version = 11 : i64} {
  func.func @_ctc_greedy_kernel(%arg0: i32, %arg1: i32, %arg2: memref<1x128x32xf32, #tpu.memory_space<vmem>>, %arg3: memref<1x8x32xf32, #tpu.memory_space<vmem>>, %arg4: memref<1x1x128xi32, #tpu.memory_space<vmem>>) attributes {dimension_semantics = [#tpu.dimension_semantics<parallel>, #tpu.dimension_semantics<parallel>], iteration_bounds = array<i64: 2, 1>, scalar_prefetch = 0 : i64, scratch_operands = 0 : i64, tpu.core_type = #tpu.core_type<tc>, window_params = [{transform_indices = @transform_0, window_bounds = array<i64: 1, 128, 32>}, {transform_indices = @transform_1, window_bounds = array<i64: 1, 8, 32>}, {transform_indices = @transform_2, window_bounds = array<i64: 1, 1, 128>}]} {
    %c0 = arith.constant 0 : index
    %c0_0 = arith.constant 0 : index
    %c0_1 = arith.constant 0 : index
    %0 = vector.load %arg2[%c0, %c0_0, %c0_1] : memref<1x128x32xf32, #tpu.memory_space<vmem>>, vector<1x128x32xf32>
    %1 = vector.shape_cast %0 : vector<1x128x32xf32> to vector<128x32xf32>
    %2 = tpu.iota {dimensions = array<i32: 1>} : vector<128x32xi32>
    %cst = arith.constant dense<0xFF800000> : vector<128xf32>
    %3 = vector.multi_reduction <maximumf>, %1, %cst [1] : vector<128x32xf32> to vector<128xf32>
    %4 = vector.shape_cast %3 : vector<128xf32> to vector<128x1xf32>
    %5 = vector.broadcast %4 : vector<128x1xf32> to vector<128x32xf32>
    %6 = arith.cmpf oeq, %1, %5 : vector<128x32xf32>
    %c32_i32 = arith.constant 32 : i32
    %7 = vector.broadcast %c32_i32 : i32 to vector<128x32xi32>
    %8 = arith.select %6, %2, %7 : vector<128x32xi1>, vector<128x32xi32>
    %9 = tpu.iota {dimensions = array<i32: 0>} : vector<32x32xi32>
    %10 = tpu.iota {dimensions = array<i32: 1>} : vector<32x32xi32>
    %11 = arith.cmpi eq, %9, %10 : vector<32x32xi32>
    %12 = arith.extui %11 : vector<32x32xi1> to vector<32x32xi32>
    %13 = arith.sitofp %12 : vector<32x32xi32> to vector<32x32xf32>
    %14 = arith.sitofp %8 : vector<128x32xi32> to vector<128x32xf32>
    %cst_2 = arith.constant dense<0.000000e+00> : vector<32x128xf32>
    %15 = tpu.matmul %13, %14, %cst_2 {dimension_numbers = #tpu.dot_dimension_numbers<[1], [1], [0], [0], [0, 0, 1, 0], [], []>} : vector<32x32xf32>, vector<128x32xf32>, vector<32x128xf32> -> vector<32x128xf32>
    %cst_3 = arith.constant dense<0x7F800000> : vector<128xf32>
    %16 = vector.multi_reduction <minimumf>, %15, %cst_3 [0] : vector<32x128xf32> to vector<128xf32>
    %17 = vector.shape_cast %16 : vector<128xf32> to vector<1x128xf32>
    %18 = arith.fptosi %17 : vector<1x128xf32> to vector<1x128xi32>
    %c31_i32 = arith.constant 31 : i32
    %19 = vector.broadcast %c31_i32 : i32 to vector<1x128xi32>
    %20 = arith.minsi %18, %19 : vector<1x128xi32>
    %c0_4 = arith.constant 0 : index
    %c0_5 = arith.constant 0 : index
    %c0_6 = arith.constant 0 : index
    %21 = vector.load %arg3[%c0_4, %c0_5, %c0_6] : memref<1x8x32xf32, #tpu.memory_space<vmem>>, vector<1x8x32xf32>
    %22 = vector.shape_cast %21 : vector<1x8x32xf32> to vector<8x32xf32>
    %23 = vector.extract_strided_slice %22 {offsets = [7, 0], sizes = [1, 32], strides = [1, 1]} : vector<8x32xf32> to vector<1x32xf32>
    %24 = tpu.iota {dimensions = array<i32: 1>} : vector<1x32xi32>
    %cst_7 = arith.constant dense<0xFF800000> : vector<1xf32>
    %25 = vector.multi_reduction <maximumf>, %23, %cst_7 [1] : vector<1x32xf32> to vector<1xf32>
    %26 = vector.shape_cast %25 : vector<1xf32> to vector<1x1xf32>
    %27 = vector.broadcast %26 : vector<1x1xf32> to vector<1x32xf32>
    %28 = arith.cmpf oeq, %23, %27 : vector<1x32xf32>
    %c32_i32_8 = arith.constant 32 : i32
    %29 = vector.broadcast %c32_i32_8 : i32 to vector<1x32xi32>
    %30 = arith.select %28, %24, %29 : vector<1x32xi1>, vector<1x32xi32>
    %cst_9 = arith.constant dense<2147483647> : vector<1xi32>
    %31 = vector.multi_reduction <minsi>, %30, %cst_9 [1] : vector<1x32xi32> to vector<1xi32>
    %32 = vector.shape_cast %31 : vector<1xi32> to vector<1x1xi32>
    %c31_i32_10 = arith.constant 31 : i32
    %33 = vector.broadcast %c31_i32_10 : i32 to vector<1x1xi32>
    %34 = arith.minsi %32, %33 : vector<1x1xi32>
    %c0_i32 = arith.constant 0 : i32
    %35 = arith.cmpi eq, %arg1, %c0_i32 : i32
    %c-1_i32 = arith.constant -1 : i32
    %36 = vector.broadcast %c-1_i32 : i32 to vector<1x1xi32>
    %37 = arith.select %35, %36, %34 : vector<1x1xi32>
    %c1_i32 = arith.constant 1 : i32
    %38 = tpu.dynamic_rotate %20 by %c1_i32 dim 1 : vector<1x128xi32>, i32 -> vector<1x128xi32>
    %39 = tpu.iota {dimensions = array<i32: 1>} : vector<1x128xi32>
    %c0_i32_11 = arith.constant 0 : i32
    %40 = vector.broadcast %c0_i32_11 : i32 to vector<1x128xi32>
    %41 = arith.cmpi eq, %39, %40 : vector<1x128xi32>
    %42 = vector.shape_cast %37 : vector<1x1xi32> to vector<1x1xi32>
    %43 = vector.broadcast %42 : vector<1x1xi32> to vector<1x128xi32>
    %44 = arith.select %41, %43, %38 : vector<1x128xi1>, vector<1x128xi32>
    %c0_i32_12 = arith.constant 0 : i32
    %45 = vector.broadcast %c0_i32_12 : i32 to vector<1x128xi32>
    %46 = arith.cmpi ne, %20, %45 : vector<1x128xi32>
    %47 = arith.cmpi ne, %20, %44 : vector<1x128xi32>
    %48 = arith.andi %46, %47 : vector<1x128xi1>
    %c-1_i32_13 = arith.constant -1 : i32
    %49 = vector.broadcast %c-1_i32_13 : i32 to vector<1x128xi32>
    %50 = arith.select %48, %20, %49 : vector<1x128xi1>, vector<1x128xi32>
    %c0_14 = arith.constant 0 : index
    %c0_15 = arith.constant 0 : index
    %c0_16 = arith.constant 0 : index
    %51 = vector.load %arg4[%c0_14, %c0_15, %c0_16] : memref<1x1x128xi32, #tpu.memory_space<vmem>>, vector<1x1x128xi32>
    %52 = vector.shape_cast %51 : vector<1x1x128xi32> to vector<1x128xi32>
    %53 = vector.shape_cast %50 : vector<1x128xi32> to vector<1x1x128xi32>
    tpu.vector_store %arg4[%c0_14, %c0_15, %c0_16], %53 {strides = array<i32>} : memref<1x1x128xi32, #tpu.memory_space<vmem>>, vector<1x1x128xi32>,
    return
  }
  func.func @transform_0(%arg0: i32, %arg1: i32) -> (i32, i32, i32) {
    %c0_i32 = arith.constant 0 : i32
    %c0_i32_0 = arith.constant 0 : i32
    return %arg0, %arg1, %c0_i32 : i32, i32, i32
  }
  func.func @transform_1(%arg0: i32, %arg1: i32) -> (i32, i32, i32) {
    %c16_i32 = arith.constant 16 : i32
    %0 = arith.muli %arg1, %c16_i32 : i32
    %c1_i32 = arith.constant 1 : i32
    %1 = arith.subi %0, %c1_i32 : i32
    %c0_i32 = arith.constant 0 : i32
    %2 = arith.maxsi %1, %c0_i32 : i32
    %c0_i32_0 = arith.constant 0 : i32
    %c0_i32_1 = arith.constant 0 : i32
    return %arg0, %2, %c0_i32_0 : i32, i32, i32
  }
  func.func @transform_2(%arg0: i32, %arg1: i32) -> (i32, i32, i32) {
    %c0_i32 = arith.constant 0 : i32
    %c0_i32_0 = arith.constant 0 : i32
    return %arg0, %c0_i32, %arg1 : i32, i32, i32
  }
}

</mosaic_0001>

<bundles_post_ra>
// kernel: tpu_custom_call.1
= control target key start
LH: loop header
LB: loop body
LE: loop exit
PB: predicated region body
PF: predicated region fallthrough
CT: control target
= control target key end

     0   :  { %7 = vsyncpa [#allocation3], 0  ;;  %s1128_s0 = inlined_call_operand.vmem [shape: f32[2,128,32], index: 0, kind: input, shape index: {}]   ;;  %s1129_s1 = inlined_call_operand.vmem [shape: f32[2,128,32], index: 1, kind: input, shape index: {}]   ;;  %s1130_s2 = inlined_call_operand.hbm [shape: s32[2,1,128], index: 2, kind: output, shape index: {}]  }
   0x1   :  { %9 = vsyncpa [#allocation3 + $0x1], 0  ;;  %s848_s9 = smov 0   ;;  %s850_s10 = smov 0  }
   0x2   :  { %s852_s11 = smov 0   ;;  %s854_s12 = smov 0  }
   0x3   :  { %s856_s13 = smov 0   ;;  %s858_s14 = smov 0  }
   0x4 LB: > { %s604_s1 = sadd.s32 4294967295, %s829_s14   ;;  %s605_s15 = sadd.s32 4294967294, %s829_s14   ;;  %s829_s14 = sphi %s858_s14, %s15_s14   ;;  %s825_s13 = sphi %s856_s13, %s1137_s13   ;;  %s821_s12 = sphi %s854_s12, %s1136_s12   ;;  %s817_s11 = sphi %s852_s11, %s1135_s11   ;;  %s813_s10 = sphi %s850_s10, %s1134_s10   ;;  %s809_s9 = sphi %s848_s9, %s1133_s9  }
   0x5   : > { %s27_s16 = sadd.s32 1, %s825_s13  ;;  %s100_s17 = sadd.s32 1, %s817_s11 }
   0x6   : > { %p29_p0 = scmp.ge.s32.totalorder %s27_s16, 2  ;;  %p110_p1 = scmp.ne.s32.totalorder %s817_s11, %s813_s10 }
   0x7   : > { %p111_p2 = scmp.eq.s32.totalorder %s604_s1, 1  ;;  %p116_p3 = scmp.ne.s32.totalorder %s813_s10, %s809_s9 }
   0x8   : > { %s1139_s16 = smov (%p29_p0, %s27_s16), 0  ;;  %p117_p5 = scmp.eq.s32.totalorder %s605_s15, 1 }
   0x9   : > { %p888_p4 = por %p111_p2, %p110_p1  ;;  %s95_s19 = ssub.s32 %s825_s13, %s1139_s16 }
   0xa   : > { %p608_p6 = scmp.ge.s32.totalorder %s829_s14, 1  ;;  %p98_p7 = scmp.eq.s32.totalorder %s95_s19, 0 }
   0xb   : > { %p895_p8 = por %p117_p5, %p116_p3  ;;  %p167_p9 = scmp.lt.s32.totalorder %s829_s14, 3 }
   0xc   : > { %s901_s21 = scalar_select %p98_p7, %s817_s11, %s100_s17  }
   0xd   : > { %p168_p10 = pnand %p608_p6, %p167_p9 }
   0xe   : > { %p205_p11 = scmp.lt.s32.totalorder (!%p168_p10), %s821_s12, 1  ;;  %s832_s27 = smov (!%p168_p10), 1  }
   0xf   : > { %171 = sbr.rel (%p168_p10) target bundleno = 493 (0x1ed), region = 28  ;;  %s202_s28 = sand.u32 (!%p168_p10), 1, %s813_s10  }
  0x10   : > { %s512_s3 = scalar_lea.hbm (!%p168_p10), %s1130_s2, %s821_s12  ;;  %s203_s4 = scalar_lea.vmem (!%p168_p10), [#allocation2], %s202_s28 }
  0x11   : > { %s514_s5 = sshll.u32 (!%p168_p10), %s203_s4, 4  ;;  %s516_s6 = sshll.u32 (!%p168_p10), %s512_s3, 4  ;;  %s515_s5 = int_to_ptr.vmem [resolvable:$true] %s514_s5  ;;  %s517_s6 = int_to_ptr.hbm [resolvable:$true] %s516_s6 }
  0x12   : > { %s503_s7 = scalar_lea.sflag (!%p168_p10), [#allocation3], %s202_s28  ;;  %s765_s8 = sshra.s32 (!%p168_p10), %s517_s6, 4  ;;  %s766_s8 = int_to_ptr.hbm [resolvable:$true] %s765_s8 }
  0x13   : > { %s771_s17 = scalar_lea.hbm (!%p168_p10), %s1130_s2, 2  ;;  %p772_p1 = scmp.lt.s32.totalorder (!%p168_p10), %s766_s8, %s1130_s2 }
  0x14   : > { %s206_s22 = scalar_select %p205_p11, %s821_s12, 1  ;;  %vm248_vm0 = vcmask 261120   ;;  %v246_v32 = vlaneseq }
  0x15   : > { %s767_s12 = scalar_lea.hbm %s766_s8, 1 }
  0x16   : > { %s639_s23 = sshll.u32 %s206_s22, 7  ;;  %v985_v33 = vand.u32 127, %v246_v32  ;;  %p768_p12 = scmp.ne.s32.totalorder %s766_s8, %s767_s12 }
  0x17   : > { %s908_s26 = scalar_lea.vmem %s1128_s0, %s639_s23  ;;  %p773_p2 = scmp.lt.s32.totalorder %s771_s17, %s767_s12 }
  0x18   : > { %v245_v0 = vld [vmem:[%s908_s26 + $0x78] sm:$0xff]  ;;  %v912_v1 = vld [vmem:[%s908_s26 + $0x68] sm:$0xff]  ;;  %v244_v6 = vld [vmem:[%s908_s26 + $0x70] sm:$0xff]  ;;  %p769_p13 = pnand %p768_p12, %p888_p4 }
  0x19   : > { %v294_v2 = vsel %vm248_vm0, %v245_v0, -inf  ;;  %v288_v3 = vsel %vm248_vm0, %v912_v1, -inf  ;;  %v918_v4 = vld [vmem:[%s908_s26 + $0x58] sm:$0xff]  ;;  %v924_v7 = vld [vmem:[%s908_s26 + $0x60] sm:$0xff]  ;;  %v927_v8 = vld [vmem:[%s908_s26 + $0x50] sm:$0xff]  ;;  %v291_v9 = vsel %vm248_vm0, %v244_v6, -inf  ;;  %p774_p3 = por %p773_p2, %p772_p1 }
  0x1a   : > { %295 = vmax.xlane.f32.xlu0 %v294_v2  ;;  %289 = vmax.xlane.f32.xlu1 %v288_v3  ;;  %v282_v5 = vsel %vm248_vm0, %v918_v4, -inf  ;;  %v285_v10 = vsel %vm248_vm0, %v924_v7, -inf  ;;  %v279_v11 = vsel %vm248_vm0, %v927_v8, -inf  ;;  %v935_v12 = vld [vmem:[%s908_s26 + $0x48] sm:$0xff]  ;;  %v938_v13 = vld [vmem:[%s908_s26 + $0x40] sm:$0xff]  ;;  %v941_v14 = vld [vmem:[%s908_s26 + $0x38] sm:$0xff]  ;;  %p770_p0 = pneg %p769_p13 }
  0x1b   : > { %283 = vmax.xlane.f32.xlu2 %v282_v5  ;;  %v276_v15 = vsel %vm248_vm0, %v935_v12, -inf  ;;  %v273_v16 = vsel %vm248_vm0, %v938_v13, -inf  ;;  %v270_v17 = vsel %vm248_vm0, %v941_v14, -inf  ;;  %v950_v18 = vld [vmem:[%s908_s26 + $0x30] sm:$0xff]  ;;  %v953_v19 = vld [vmem:[%s908_s26 + $0x28] sm:$0xff]  ;;  %v956_v20 = vld [vmem:[%s908_s26 + $0x20] sm:$0xff] }
  0x1c   : > { %v267_v21 = vsel %vm248_vm0, %v950_v18, -inf  ;;  %v264_v22 = vsel %vm248_vm0, %v953_v19, -inf  ;;  %v261_v23 = vsel %vm248_vm0, %v956_v20, -inf  ;;  %v965_v24 = vld [vmem:[%s908_s26 + $0x18] sm:$0xff]  ;;  %v968_v25 = vld [vmem:[%s908_s26 + $0x10] sm:$0xff]  ;;  %v971_v26 = vld [vmem:[%s908_s26 + $0x8] sm:$0xff]  ;;  %p775_p5 = pnand %p774_p3, %p770_p0 }
  0x1d   : > { %v258_v27 = vsel %vm248_vm0, %v965_v24, -inf  ;;  %v255_v28 = vsel %vm248_vm0, %v968_v25, -inf  ;;  %v252_v29 = vsel %vm248_vm0, %v971_v26, -inf  ;;  %v980_v30 = vld [vmem:[%s908_s26] sm:$0xff] }
  0x1e   : > { %v249_v31 = vsel %vm248_vm0, %v980_v30, -inf }
  0x22   : > { %292 = vmax.xlane.f32.xlu0 %v291_v9  ;;  %286 = vmax.xlane.f32.xlu1 %v285_v10 }
  0x23   : > { %280 = vmax.xlane.f32.xlu2 %v279_v11 }
  0x2a   : > { %277 = vmax.xlane.f32.xlu0 %v276_v15  ;;  %274 = vmax.xlane.f32.xlu1 %v273_v16  ;;  %v330_v15 = vshrl.u32 %v246_v32, 7 }
  0x2b   : > { %271 = vmax.xlane.f32.xlu2 %v270_v17 }
  0x32   : > { %268 = vmax.xlane.f32.xlu0 %v267_v21  ;;  %265 = vmax.xlane.f32.xlu1 %v264_v22  ;;  %v831_v22 = vmov 0.0  }
  0x33   : > { %262 = vmax.xlane.f32.xlu2 %v261_v23 }
  0x3a   : > { %259 = vmax.xlane.f32.xlu0 %v258_v27  ;;  %256 = vmax.xlane.f32.xlu1 %v255_v28 }
  0x3b   : > { %253 = vmax.xlane.f32.xlu2 %v252_v29 }
  0x42   : > { %250 = vmax.xlane.f32.xlu0 %v249_v31 }
  0x8d   : > { %v296_v34 = vpop.xlane.xlu0 %295  ;;  %v290_v35 = vpop.xlane.xlu1 %289 }
  0x8e   : > { %vm312_vm1 = vcmp.eq.f32.partialorder %v245_v0, %v296_v34  ;;  %v284_v38 = vpop.xlane.xlu2 %283  ;;  %vm310_vm3 = vcmp.eq.f32.partialorder %v912_v1, %v290_v35 }
  0x8f   : > { %v328_v36 = vsel %vm312_vm1, %v985_v33, 32  ;;  %v326_v43 = vsel %vm310_vm3, %v985_v33, 32  ;;  %vm308_vm5 = vcmp.eq.f32.partialorder %v918_v4, %v284_v38 }
  0x90   : > { %v361_v37 = vcvt.s32.f32 %v328_v36  ;;  %v359_v45 = vcvt.s32.f32 %v326_v43  ;;  %v324_v48 = vsel %vm308_vm5, %v985_v33, 32 }
  0x91   : > { %v357_v51 = vcvt.s32.f32 %v324_v48 }
  0x92   : > { %617 = vmatpush.xpose.msk.msra.mxu0 %vm248_vm0, %v361_v37  ;;  %641 = vmatpush.xpose.msk.msra.mxu1 %vm248_vm0, %v361_v37 }
  0x93   : > { %642 = vmatpush.xpose.msk.msra.mxu2 %vm248_vm0, %v361_v37  ;;  %643 = vmatpush.xpose.msk.msra.mxu3 %vm248_vm0, %v361_v37 }
  0x95   : > { %v293_v39 = vpop.xlane.xlu0 %292  ;;  %v287_v40 = vpop.xlane.xlu1 %286 }
  0x96   : > { %vm311_vm2 = vcmp.eq.f32.partialorder %v244_v6, %v293_v39  ;;  %vm309_vm4 = vcmp.eq.f32.partialorder %v924_v7, %v287_v40  ;;  %v281_v46 = vpop.xlane.xlu2 %280 }
  0x97   : > { %v327_v41 = vsel %vm311_vm2, %v985_v33, 32  ;;  %v325_v44 = vsel %vm309_vm4, %v985_v33, 32  ;;  %vm307_vm6 = vcmp.eq.f32.partialorder %v927_v8, %v281_v46  ;;  %vm334_vm2 = vcmp.eq.s32.totalorder %v330_v15, %v985_v33 }
  0x98   : > { %v360_v42 = vcvt.s32.f32 %v327_v41  ;;  %v358_v47 = vcvt.s32.f32 %v325_v44  ;;  %v323_v50 = vsel %vm307_vm6, %v985_v33, 32  ;;  %v613_v23 = vsel %vm334_vm2, 1.0, %v831_v22 }
  0x99   : > { %v356_v53 = vcvt.s32.f32 %v323_v50 }
  0x9a   : > { %618 = vmatpush.xpose.msk.msra.mxu0 %vm248_vm0, %v360_v42  ;;  %644 = vmatpush.xpose.msk.msra.mxu1 %vm248_vm0, %v360_v42 }
  0x9b   : > { %645 = vmatpush.xpose.msk.msra.mxu2 %vm248_vm0, %v360_v42  ;;  %646 = vmatpush.xpose.msk.msra.mxu3 %vm248_vm0, %v360_v42 }
  0x9d   : > { %v278_v49 = vpop.xlane.xlu0 %277  ;;  %v275_v52 = vpop.xlane.xlu1 %274 }
  0x9e   : > { %619 = vmatpush.xpose.msk.msra.mxu0 %vm248_vm0, %v359_v45  ;;  %647 = vmatpush.xpose.msk.msra.mxu1 %vm248_vm0, %v359_v45  ;;  %vm306_vm7 = vcmp.eq.f32.partialorder %v935_v12, %v278_v49  ;;  %vm305_vm8 = vcmp.eq.f32.partialorder %v938_v13, %v275_v52  ;;  %v272_v55 = vpop.xlane.xlu2 %271 }
  0x9f   : > { %648 = vmatpush.xpose.msk.msra.mxu2 %vm248_vm0, %v359_v45  ;;  %649 = vmatpush.xpose.msk.msra.mxu3 %vm248_vm0, %v359_v45  ;;  %v322_v54 = vsel %vm306_vm7, %v985_v33, 32  ;;  %v321_v57 = vsel %vm305_vm8, %v985_v33, 32  ;;  %vm304_vm9 = vcmp.eq.f32.partialorder %v941_v14, %v272_v55  ;;  %vm494_vm7 = vcmp.eq.s32.totalorder %v985_v33, 0 }
  0xa0   : > { %v355_v56 = vcvt.s32.f32 %v322_v54  ;;  %v354_v59 = vcvt.s32.f32 %v321_v57  ;;  %v320_v60 = vsel %vm304_vm9, %v985_v33, 32 }
  0xa1   : > { %v353_v62 = vcvt.s32.f32 %v320_v60 }
  0xa2   : > { %620 = vmatpush.xpose.msk.msra.mxu0 %vm248_vm0, %v358_v47  ;;  %650 = vmatpush.xpose.msk.msra.mxu1 %vm248_vm0, %v358_v47 }
  0xa3   : > { %651 = vmatpush.xpose.msk.msra.mxu2 %vm248_vm0, %v358_v47  ;;  %652 = vmatpush.xpose.msk.msra.mxu3 %vm248_vm0, %v358_v47 }
  0xa5   : > { %v269_v58 = vpop.xlane.xlu0 %268  ;;  %v266_v61 = vpop.xlane.xlu1 %265 }
  0xa6   : > { %621 = vmatpush.xpose.msk.msra.mxu0 %vm248_vm0, %v357_v51  ;;  %653 = vmatpush.xpose.msk.msra.mxu1 %vm248_vm0, %v357_v51  ;;  %vm303_vm10 = vcmp.eq.f32.partialorder %v950_v18, %v269_v58  ;;  %vm302_vm11 = vcmp.eq.f32.partialorder %v953_v19, %v266_v61  ;;  %v263_v0 = vpop.xlane.xlu2 %262  ;;  %v331_v18 = vadd.s32 8, %v330_v15  ;;  %v332_v19 = vadd.s32 16, %v330_v15 }
  0xa7   : > { %654 = vmatpush.xpose.msk.msra.mxu2 %vm248_vm0, %v357_v51  ;;  %655 = vmatpush.xpose.msk.msra.mxu3 %vm248_vm0, %v357_v51  ;;  %v319_v63 = vsel %vm303_vm10, %v985_v33, 32  ;;  %v318_v2 = vsel %vm302_vm11, %v985_v33, 32  ;;  %vm301_vm12 = vcmp.eq.f32.partialorder %v956_v20, %v263_v0  ;;  %v333_v20 = vadd.s32 24, %v330_v15 }
  0xa8   : > { %v352_v1 = vcvt.s32.f32 %v319_v63  ;;  %v351_v4 = vcvt.s32.f32 %v318_v2  ;;  %v317_v5 = vsel %vm301_vm12, %v985_v33, 32  ;;  %vm335_vm3 = vcmp.eq.s32.totalorder %v331_v18, %v985_v33 }
  0xa9   : > { %v350_v7 = vcvt.s32.f32 %v317_v5  ;;  %vm336_vm4 = vcmp.eq.s32.totalorder %v332_v19, %v985_v33  ;;  %vm337_vm5 = vcmp.eq.s32.totalorder %v333_v20, %v985_v33 }
  0xaa   : > { %622 = vmatpush.xpose.msk.msra.mxu0 %vm248_vm0, %v356_v53  ;;  %656 = vmatpush.xpose.msk.msra.mxu1 %vm248_vm0, %v356_v53 }
  0xab   : > { %657 = vmatpush.xpose.msk.msra.mxu2 %vm248_vm0, %v356_v53  ;;  %658 = vmatpush.xpose.msk.msra.mxu3 %vm248_vm0, %v356_v53 }
  0xad   : > { %v260_v3 = vpop.xlane.xlu0 %259  ;;  %v257_v6 = vpop.xlane.xlu1 %256 }
  0xae   : > { %623 = vmatpush.xpose.msk.msra.mxu0 %vm248_vm0, %v355_v56  ;;  %659 = vmatpush.xpose.msk.msra.mxu1 %vm248_vm0, %v355_v56  ;;  %vm300_vm13 = vcmp.eq.f32.partialorder %v965_v24, %v260_v3  ;;  %vm299_vm14 = vcmp.eq.f32.partialorder %v968_v25, %v257_v6  ;;  %v254_v9 = vpop.xlane.xlu2 %253  ;;  %v614_v24 = vsel %vm335_vm3, 1.0, %v831_v22  ;;  %v615_v25 = vsel %vm336_vm4, 1.0, %v831_v22 }
  0xaf   : > { %660 = vmatpush.xpose.msk.msra.mxu2 %vm248_vm0, %v355_v56  ;;  %661 = vmatpush.xpose.msk.msra.mxu3 %vm248_vm0, %v355_v56  ;;  %v316_v8 = vsel %vm300_vm13, %v985_v33, 32  ;;  %v315_v11 = vsel %vm299_vm14, %v985_v33, 32  ;;  %vm298_vm15 = vcmp.eq.f32.partialorder %v971_v26, %v254_v9  ;;  %v616_v26 = vsel %vm337_vm5, 1.0, %v831_v22 }
  0xb0   : > { %v349_v10 = vcvt.s32.f32 %v316_v8  ;;  %v348_v13 = vcvt.s32.f32 %v315_v11  ;;  %v314_v14 = vsel %vm298_vm15, %v985_v33, 32 }
  0xb1   : > { %v347_v16 = vcvt.s32.f32 %v314_v14 }
  0xb2   : > { %624 = vmatpush.xpose.msk.msra.mxu0 %vm248_vm0, %v354_v59  ;;  %662 = vmatpush.xpose.msk.msra.mxu1 %vm248_vm0, %v354_v59 }
  0xb3   : > { %663 = vmatpush.xpose.msk.msra.mxu2 %vm248_vm0, %v354_v59  ;;  %664 = vmatpush.xpose.msk.msra.mxu3 %vm248_vm0, %v354_v59 }
  0xb5   : > { %v251_v12 = vpop.xlane.xlu0 %250 }
  0xb6   : > { %625 = vmatpush.xpose.msk.msra.mxu0 %vm248_vm0, %v353_v62  ;;  %665 = vmatpush.xpose.msk.msra.mxu1 %vm248_vm0, %v353_v62  ;;  %vm297_vm1 = vcmp.eq.f32.partialorder %v980_v30, %v251_v12 }
  0xb7   : > { %666 = vmatpush.xpose.msk.msra.mxu2 %vm248_vm0, %v353_v62  ;;  %667 = vmatpush.xpose.msk.msra.mxu3 %vm248_vm0, %v353_v62  ;;  %v313_v17 = vsel %vm297_vm1, %v985_v33, 32 }
  0xb8   : > { %v346_v21 = vcvt.s32.f32 %v313_v17 }
  0xba   : > { %626 = vmatpush.xpose.msk.msra.mxu0 %vm248_vm0, %v352_v1  ;;  %668 = vmatpush.xpose.msk.msra.mxu1 %vm248_vm0, %v352_v1 }
  0xbb   : > { %669 = vmatpush.xpose.msk.msra.mxu2 %vm248_vm0, %v352_v1  ;;  %670 = vmatpush.xpose.msk.msra.mxu3 %vm248_vm0, %v352_v1 }
  0xbe   : > { %627 = vmatpush.xpose.msk.msra.mxu0 %vm248_vm0, %v351_v4  ;;  %671 = vmatpush.xpose.msk.msra.mxu1 %vm248_vm0, %v351_v4 }
  0xbf   : > { %672 = vmatpush.xpose.msk.msra.mxu2 %vm248_vm0, %v351_v4  ;;  %673 = vmatpush.xpose.msk.msra.mxu3 %vm248_vm0, %v351_v4 }
  0xc2   : > { %628 = vmatpush.xpose.msk.msra.mxu0 %vm248_vm0, %v350_v7  ;;  %674 = vmatpush.xpose.msk.msra.mxu1 %vm248_vm0, %v350_v7 }
  0xc3   : > { %675 = vmatpush.xpose.msk.msra.mxu2 %vm248_vm0, %v350_v7  ;;  %676 = vmatpush.xpose.msk.msra.mxu3 %vm248_vm0, %v350_v7 }
  0xc6   : > { %629 = vmatpush.xpose.msk.msra.mxu0 %vm248_vm0, %v349_v10  ;;  %677 = vmatpush.xpose.msk.msra.mxu1 %vm248_vm0, %v349_v10 }
  0xc7   : > { %678 = vmatpush.xpose.msk.msra.mxu2 %vm248_vm0, %v349_v10  ;;  %679 = vmatpush.xpose.msk.msra.mxu3 %vm248_vm0, %v349_v10 }
  0xca   : > { %630 = vmatpush.xpose.msk.msra.mxu0 %vm248_vm0, %v348_v13  ;;  %680 = vmatpush.xpose.msk.msra.mxu1 %vm248_vm0, %v348_v13 }
  0xcb   : > { %681 = vmatpush.xpose.msk.msra.mxu2 %vm248_vm0, %v348_v13  ;;  %682 = vmatpush.xpose.msk.msra.mxu3 %vm248_vm0, %v348_v13 }
  0xce   : > { %631 = vmatpush.xpose.msk.msra.mxu0 %vm248_vm0, %v347_v16  ;;  %683 = vmatpush.xpose.msk.msra.mxu1 %vm248_vm0, %v347_v16 }
  0xcf   : > { %684 = vmatpush.xpose.msk.msra.mxu2 %vm248_vm0, %v347_v16  ;;  %685 = vmatpush.xpose.msk.msra.mxu3 %vm248_vm0, %v347_v16 }
  0xd2   : > { %632 = vmatpush.xpose.msk.msra.mxu0 %vm248_vm0, %v346_v21  ;;  %686 = vmatpush.xpose.msk.msra.mxu1 %vm248_vm0, %v346_v21 }
  0xd3   : > { %687 = vmatpush.xpose.msk.msra.mxu2 %vm248_vm0, %v346_v21  ;;  %688 = vmatpush.xpose.msk.msra.mxu3 %vm248_vm0, %v346_v21 }
  0xd5   : > { %633 = vmatmul.msk.f32.vlgmr.msra.gmra.mxu0 %vm248_vm0, %v613_v23  ;;  %634 = vmatmul.msk.f32.vlgmr.msra.gmra.mxu1 %vm248_vm0, %v614_v24 }
  0xd6   : > { %635 = vmatmul.msk.f32.vlgmr.msra.gmra.mxu2 %vm248_vm0, %v615_v25  ;;  %636 = vmatmul.msk.f32.vlgmr.msra.gmra.mxu3 %vm248_vm0, %v616_v26 }
 0x152   : > { %v439_v27 = vpop.f32.mrf.mxu0  ;;  %v442_v28 = vpop.f32.mrf.mxu1 }
 0x153   : > { %v451_v29 = vmin.f32 %v439_v27, %v442_v28 }
 0x159   : > { %v445_v30 = vpop.f32.mrf.mxu2  ;;  %v448_v31 = vpop.f32.mrf.mxu3 }
 0x15a   : > { %v452_v32 = vmin.f32 %v445_v30, %v448_v31 }
 0x15c   : > { %v453_v34 = vmin.f32 %v451_v29, %v452_v32 }
 0x15e   : > { %v454_v35 = vrot.slane %v453_v34, 4 }
 0x160   : > { %v455_v36 = vmin.f32 %v453_v34, %v454_v35 }
 0x162   : > { %v456_v37 = vrot.slane %v455_v36, 2 }
 0x164   : > { %v457_v38 = vmin.f32 %v455_v36, %v456_v37 }
 0x166   : > { %v458_v39 = vrot.slane %v457_v38, 1 }
 0x168   : > { %v459_v40 = vmin.f32 %v457_v38, %v458_v39 }
 0x16a   : > { %vm689_vm6 = vcmp.lt.s32.totalorder %v459_v40, 0  ;;  %v690_v41 = vceil.f32 %v459_v40  ;;  %v691_v42 = vfloor.f32 %v459_v40 }
 0x16c   : > { %v692_v43 = vsel %vm689_vm6, %v690_v41, %v691_v42 }
 0x16d   : > { %v693_v44 = vcvt.f32.s32 %v692_v43 }
 0x16f   : > { %vm461_vm0 = vcmp.lt.s32.totalorder %v693_v44, 31 }
 0x170   : > { %v462_v45 = vsel %vm461_vm0, %v693_v44, 31 }
 0x171   : > { %492 = vrot.lane.b32.xlu1 %v462_v45, %s832_s27  ;;  %vm497_vm8 = vcmp.ne.s32.totalorder %v462_v45, 0 }
 0x1e3   : > { %v493_v46 = vpop.permute.xlu1 %492 }
 0x1e4   : > { %v495_v47 = vrot.slane %v493_v46, 1 }
 0x1e6   : > { %v496_v48 = vsel %vm494_vm7, 4294967295, %v495_v47 }
 0x1e7   : > { %vm498_vm9 = vcmp.ne.s32.totalorder %v462_v45, %v496_v48 }
 0x1e8   : > { %vm499_vm10 = vmand %vm497_vm8, %vm498_vm9 }
 0x1e9   : > { %v500_v49 = vsel %vm499_vm10, %v462_v45, 4294967295 }
 0x1ea   : > { %501 = vst [vmem:[%s203_s4 - $0x7] sm:$0x80] %v500_v49 }
 0x1eb   : > { %778 = shalt.err (!%p775_p5)
}
 0x1ec   : > { %694 = dma.vmem_to_hbm [thread:$0]  (%p888_p4), %s515_s5, 16, %s517_s6, %s503_s7  }
 0x1ed PF: > { %p700_p6 = scmp.ge.s32.totalorder %s829_s14, 2  ;;  %s528_s23 = sand.u32 1, %s809_s9  }
 0x1ee   : > { %s529_s24 = scalar_lea.sflag [#allocation3], %s528_s23 }
 0x1ef   : > { %p697_p7 = pnand %p700_p6, %p895_p8 }
 0x1f1   : > { %p698_p9 = pneg %p697_p7 }
 0x1f3   : > { %804 = dma.done.wait (%p698_p9), %s529_s24, 16  }
 0x1f4   : > { %806 = vsyncadd (%p698_p9), %s529_s24, 4294967280  ;;  %s15_s14 = sadd.s32 1, %s829_s14   ;;  %s1133_s9 = smov %s813_s10 }
 0x1f5   : > { %p12_p10 = scmp.ge.s32.totalorder %s15_s14, 4   ;;  %s1134_s10 = smov %s817_s11 }
 0x1f6   : > { %s1135_s11 = smov %s901_s21  ;;  %s1136_s12 = smov %s825_s13 }
 0x1f7   : > { %s1137_s13 = smov %s1139_s16  ;;  %14 = sbr.rel (!%p12_p10) target bundleno = 4 (0x4), region = 66 }
 0x1fc   :  { %534 = vsyncpa [#allocation3], 1 }
 0x1fd   :  { %536 = vsyncpa [#allocation3 + $0x1], 1 }

</bundles_post_ra>
